<compile_context>
chip_gen: v7x
topology: tpu7x:2x2x1
jax: 0.10.0
libtpu: 0.0.40
codegen_flags: <defaults>
</compile_context>

<pallas_src>
import functools
import math

import jax
import jax.numpy as jnp
from jax.experimental import pallas as pl
from jax.experimental.pallas import tpu as pltpu

_MIB = 1024 * 1024


def _resmlp_fused_kernel(x_ref, w1t_ref, b1_ref, w2_ref, b2_ref, o_ref, *,
                         g_slices, hidden_dim, approx_gelu, compute_dtype, precision):
    """Fused fc1 + GELU + fc2 (1x1 conv) for G packed (b, h) slices.

    x_ref  : [G*C, W]   packed activations; C = hidden_dim rows/slice, W = input_dim
    w1t_ref: [W, N]     fc1 weight transposed; N = hidden_dim
    b1_ref : [1, N]     fc1 bias (f32)
    w2_ref : [O, C]     1x1-conv weight; O = input_dim (out channels)
    b2_ref : [O, 1]     conv bias (f32)
    o_ref  : [G, O, N]
    """
    C = hidden_dim

    # --- fc1: ONE flat MXU matmul over all packed slices (perf feedback #1). ---
    y = jnp.dot(x_ref[...], w1t_ref[...],
                preferred_element_type=jnp.float32,
                precision=precision)                      # [G*C, N], f32 accumulate
    y = y + b1_ref[...]                                   # row broadcast
    if approx_gelu:
        # tanh-approx GELU -> native EUP transcendental (separate VLIW slot).
        y = jax.nn.gelu(y, approximate=True)
    else:
        # exact erf GELU: bit-faithful to PyTorch nn.GELU() on the parity path.
        y = 0.5 * y * (1.0 + jax.lax.erf(y * (1.0 / math.sqrt(2.0))))
    # Dropout(p=0.0) is the identity -> no-op.
    y = y.astype(compute_dtype)                           # bf16 operands for 2nd MXU pass

    # --- fc2: per-slice [O,C] @ [C,N]; w2 stationary, results stored immediately. ---
    w2 = w2_ref[...]
    b2 = b2_ref[...]
    for g in range(g_slices):
        y_g = y[g * C:(g + 1) * C, :]                     # static, sublane-aligned slice
        z = jnp.dot(w2, y_g,
                    preferred_element_type=jnp.float32,
                    precision=precision)                  # [O, N]
        z = z + b2                                        # column broadcast
        # Dropout(p=0.0) is the identity -> no-op.
        o_ref[g] = z.astype(o_ref.dtype)


def _vmem_capacity_bytes():
    try:
        return int(pltpu.get_tpu_info().vmem_capacity_bytes)
    except Exception:
        return 64 * _MIB   # conservative default (v7x per-TensorCore physical VMEM)


def _per_step_vmem_bytes(g, C, W, N, O, in_item, out_item, w_item, comp_item,
                         weight_bufs):
    """Estimate of per-step VMEM: double-buffered activations, resident weights,
    and the f32 / compute-dtype intermediates actually live per step."""
    b = 2 * g * C * W * in_item            # x blocks (double-buffered)
    b += 2 * g * O * N * out_item          # out blocks (double-buffered)
    b += weight_bufs * ((W * N + O * C) * w_item + (N + O) * 4)   # weights + f32 biases
    b += g * C * N * 4                     # f32 fc1 accumulate
    b += g * C * N * comp_item             # compute-dtype copy fed to fc2
    b += O * N * 4                         # per-slice fc2 f32 accumulate
    return b


def _pick_slices_per_step(m, fits, max_g):
    """Largest divisor g of m (<= max_g) that fits the VMEM budget, preferring an even
    number of grid steps (2-TC sharding on v7x), then >= 2 steps, then anything."""
    divisors = [d for d in range(1, m + 1) if m % d == 0 and d <= max_g]
    preds = (lambda d: (m // d) >= 2 and (m // d) % 2 == 0,
             lambda d: (m // d) >= 2,
             lambda d: True)
    for pred in preds:
        cands = [d for d in divisors if pred(d) and fits(d)]
        if cands:
            return max(cands)
    return 1


@functools.partial(
    jax.jit,
    static_argnames=("precision", "slices_per_step", "buffered_weights"))
def _resmlp_forward_impl(x, w1, b1, w2, b2, *, precision, slices_per_step,
                         buffered_weights):
    B, C, H, W = x.shape
    hidden_dim, input_dim = w1.shape
    out_ch = w2.shape[0]
    assert W == input_dim, "fc1 (nn.Linear) contracts the last axis => W must equal input_dim"
    assert C == hidden_dim, "fc2 (1x1 conv) contracts channels => C must equal hidden_dim"
    assert w2.shape[1] == hidden_dim and w2.shape[2:] == (1, 1)
    N = hidden_dim
    O = out_ch
    M = B * H

    fast = (precision == jax.lax.Precision.DEFAULT)
    compute_dtype = jnp.bfloat16 if fast else jnp.float32

    # Single input layout pass: transpose + (bf16) cast fuse into one HBM pass in XLA;
    # the trailing reshape to [M*C, W] is metadata-only, so the kernel receives an
    # already-flat 2-D activation block (no in-kernel reshape needed for fc1).
    xt = jnp.transpose(x, (0, 2, 1, 3)).astype(compute_dtype).reshape(M * C, W)

    w1t = jnp.transpose(w1).astype(compute_dtype)   # [W, N]
    b1r = b1.reshape(1, N).astype(jnp.float32)      # [1, N]
    w2m = w2.reshape(O, C).astype(compute_dtype)    # [O, C]
    b2c = b2.reshape(O, 1).astype(jnp.float32)      # [O, 1]

    in_item = jnp.dtype(compute_dtype).itemsize
    out_item = jnp.dtype(x.dtype).itemsize
    comp_item = in_item
    w_item = in_item
    weight_bufs = 1 if buffered_weights else 2

    # Generation-aware VMEM budget: ~75% of the physical per-core VMEM
    # (48 MiB on 64 MiB v7x cores, ~96 MiB on 128 MiB v5e/v6e), plus Mosaic slack.
    capacity = _vmem_capacity_bytes()
    budget = min(int(capacity * 0.75), capacity - 8 * _MIB)
    slack = 2 * _MIB

    def fits(g):
        return _per_step_vmem_bytes(g, C, W, N, O, in_item, out_item, w_item,
                                    comp_item, weight_bufs) + slack <= budget

    max_g = min(M, 16) if slices_per_step is None else max(1, min(M, slices_per_step))
    G = _pick_slices_per_step(M, fits, max_g)
    grid = (M // G,)

    est = _per_step_vmem_bytes(G, C, W, N, O, in_item, out_item, w_item,
                               comp_item, weight_bufs) + slack
    vmem_limit = None
    if est > 16 * _MIB:
        # Never exceed the generation-aware budget (leaves >= 8 MiB headroom below
        # physical VMEM); see TODO about K-reduction streaming for huge weights.
        vmem_limit = int(min(max(est, 16 * _MIB), budget))

    kernel = functools.partial(
        _resmlp_fused_kernel, g_slices=G, hidden_dim=C,
        approx_gelu=fast, compute_dtype=compute_dtype, precision=precision)

    def _const_spec(shape):
        idx = lambda i, _s=shape: (0,) * len(_s)
        if buffered_weights:
            # Constant index_map -> single-buffer the resident weights/biases.
            return pl.BlockSpec(shape, idx, pipeline_mode=pl.Buffered(1))
        return pl.BlockSpec(shape, idx)

    cost = pl.CostEstimate(
        flops=2 * M * C * N * (W + O),          # fc1 + fc2 MACs * 2
        transcendentals=M * C * N,              # one erf/tanh per intermediate element
        bytes_accessed=(M * C * W * in_item + M * O * N * out_item
                        + (W * N + O * C) * w_item + (N + O) * 4),
    )

    z = pl.pallas_call(
        kernel,
        out_shape=jax.ShapeDtypeStruct((M, O, N), x.dtype),
        grid=grid,
        in_specs=[
            pl.BlockSpec((G * C, W), lambda i: (i, 0)),   # packed activations (flat 2-D)
            _const_spec((W, N)),                          # fc1 weight^T (VMEM-resident)
            _const_spec((1, N)),                          # fc1 bias
            _const_spec((O, C)),                          # conv1x1 weight (VMEM-resident)
            _const_spec((O, 1)),                          # conv1x1 bias
        ],
        # Output block is lane-dense (minor dim = hidden_dim) at real model dims.
        out_specs=pl.BlockSpec((G, O, N), lambda i: (i, 0, 0)),
        compiler_params=pltpu.CompilerParams(
            dimension_semantics=("parallel",),
            vmem_limit_bytes=vmem_limit,
        ),
        cost_estimate=cost,
    )(xt, w1t, b1r, w2m, b2c)

    # [M, O, N] -> [B, O, H, N] == NCHW output [B, input_dim, H, hidden_dim]
    return z.reshape(B, H, O, N).transpose(0, 2, 1, 3)


def resmlp_forward(x, w1, b1, w2, b2, *,
                   precision=jax.lax.Precision.DEFAULT, slices_per_step=None):
    """ResMLP forward.

    x : [B, C, H, W] (NCHW) with C == hidden_dim, W == input_dim
    w1: [hidden_dim, input_dim]        (nn.Linear weight)
    b1: [hidden_dim]
    w2: [input_dim, hidden_dim, 1, 1]  (nn.Conv2d 1x1 weight)
    b2: [input_dim]
    returns [B, input_dim, H, hidden_dim]
    """
    try:
        return _resmlp_forward_impl(x, w1, b1, w2, b2, precision=precision,
                                    slices_per_step=slices_per_step,
                                    buffered_weights=True)
    except Exception:
        # Fallback if this Pallas build rejects pipeline_mode=pl.Buffered(1):
        # identical kernel, default (double-buffered) weight blocks.
        return _resmlp_forward_impl(x, w1, b1, w2, b2, precision=precision,
                                    slices_per_step=slices_per_step,
                                    buffered_weights=False)


def resmlp_reference(x, w1, b1, w2, b2):
    """Pure-JAX f32 reference mirroring the PyTorch forward exactly (erf GELU)."""
    y = jnp.einsum("bchw,nw->bchn", x, w1,
                   precision=jax.lax.Precision.HIGHEST) + b1
    y = 0.5 * y * (1.0 + jax.lax.erf(y / jnp.sqrt(2.0)))
    z = jnp.einsum("bchn,oc->bohn", y, w2[:, :, 0, 0],
                   precision=jax.lax.Precision.HIGHEST)
    return z + b2[None, :, None, None]


if __name__ == "__main__":
    B, H_sp = 2, 4
    input_dim, hidden_dim = 16, 32

    key = jax.random.PRNGKey(0)
    kx, kw1, kb1, kw2, kb2 = jax.random.split(key, 5)

    # x layout: [B, C=hidden_dim, H, W=input_dim] (only layout for which forward type-checks)
    x = jax.random.normal(kx, (B, hidden_dim, H_sp, input_dim), dtype=jnp.float32)

    # PyTorch-style uniform(-1/sqrt(fan_in), +1/sqrt(fan_in)) init, deterministic.
    bound1 = 1.0 / math.sqrt(input_dim)
    w1 = jax.random.uniform(kw1, (hidden_dim, input_dim), jnp.float32, -bound1, bound1)
    b1 = jax.random.uniform(kb1, (hidden_dim,), jnp.float32, -bound1, bound1)
    bound2 = 1.0 / math.sqrt(hidden_dim)  # conv fan_in = hidden_dim * 1 * 1
    w2 = jax.random.uniform(kw2, (input_dim, hidden_dim, 1, 1), jnp.float32, -bound2, bound2)
    b2 = jax.random.uniform(kb2, (input_dim,), jnp.float32, -bound2, bound2)

    ref = resmlp_reference(x, w1, b1, w2, b2)

    # Fast path: bf16 operands, DEFAULT MXU precision, tanh GELU -> relaxed tolerance.
    out_fast = jax.block_until_ready(
        resmlp_forward(x, w1, b1, w2, b2, precision=jax.lax.Precision.DEFAULT))
    assert out_fast.shape == (B, input_dim, H_sp, hidden_dim), out_fast.shape
    assert jnp.allclose(out_fast, ref, atol=5e-2, rtol=5e-2), \
        float(jnp.max(jnp.abs(out_fast - ref)))

    # Parity path: f32 operands, HIGHEST precision, exact erf GELU -> tight tolerance.
    out_exact = jax.block_until_ready(
        resmlp_forward(x, w1, b1, w2, b2, precision=jax.lax.Precision.HIGHEST))
    assert out_exact.shape == (B, input_dim, H_sp, hidden_dim), out_exact.shape
    assert jnp.allclose(out_exact, ref, atol=1e-4, rtol=1e-4), \
        float(jnp.max(jnp.abs(out_exact - ref)))

    print("KERNEL_OK")
</pallas_src>

<mosaic_0001>
module attributes {stable_mosaic.version = 11 : i64} {
  func.func @_resmlp_fused_kernel(%arg0: i32, %arg1: memref<128x16xbf16, #tpu.memory_space<vmem>>, %arg2: memref<16x32xbf16, #tpu.memory_space<vmem>>, %arg3: memref<1x32xf32, #tpu.memory_space<vmem>>, %arg4: memref<16x32xbf16, #tpu.memory_space<vmem>>, %arg5: memref<16x1xf32, #tpu.memory_space<vmem>>, %arg6: memref<4x16x32xf32, #tpu.memory_space<vmem>>) attributes {dimension_semantics = [#tpu.dimension_semantics<parallel>], iteration_bounds = array<i64: 2>, scalar_prefetch = 0 : i64, scratch_operands = 0 : i64, tpu.core_type = #tpu.core_type<tc>, window_params = [{transform_indices = @transform_0, window_bounds = array<i64: 128, 16>}, {pipeline_mode = #tpu.pipeline_mode<synchronous>, transform_indices = @transform_1, window_bounds = array<i64: 16, 32>}, {pipeline_mode = #tpu.pipeline_mode<synchronous>, transform_indices = @transform_2, window_bounds = array<i64: 1, 32>}, {pipeline_mode = #tpu.pipeline_mode<synchronous>, transform_indices = @transform_3, window_bounds = array<i64: 16, 32>}, {pipeline_mode = #tpu.pipeline_mode<synchronous>, transform_indices = @transform_4, window_bounds = array<i64: 16, 1>}, {transform_indices = @transform_5, window_bounds = array<i64: 4, 16, 32>}]} {
    %c0 = arith.constant 0 : index
    %c0_0 = arith.constant 0 : index
    %0 = vector.load %arg1[%c0, %c0_0] : memref<128x16xbf16, #tpu.memory_space<vmem>>, vector<128x16xbf16>
    %c0_1 = arith.constant 0 : index
    %c0_2 = arith.constant 0 : index
    %1 = vector.load %arg2[%c0_1, %c0_2] : memref<16x32xbf16, #tpu.memory_space<vmem>>, vector<16x32xbf16>
    %cst = arith.constant dense<0.000000e+00> : vector<128x32xf32>
    %2 = tpu.matmul %0, %1, %cst {dimension_numbers = #tpu.dot_dimension_numbers<[1], [0], [0], [1], [0, 0, 1, 1], [], []>} : vector<128x16xbf16>, vector<16x32xbf16>, vector<128x32xf32> -> vector<128x32xf32>
    %c0_3 = arith.constant 0 : index
    %c0_4 = arith.constant 0 : index
    %3 = vector.load %arg3[%c0_3, %c0_4] : memref<1x32xf32, #tpu.memory_space<vmem>>, vector<1x32xf32>
    %4 = vector.broadcast %3 : vector<1x32xf32> to vector<128x32xf32>
    %5 = arith.addf %2, %4 : vector<128x32xf32>
    %6 = arith.mulf %5, %5 : vector<128x32xf32>
    %7 = arith.mulf %5, %6 : vector<128x32xf32>
    %cst_5 = arith.constant 4.471500e-02 : f32
    %8 = vector.broadcast %cst_5 : f32 to vector<128x32xf32>
    %9 = arith.mulf %8, %7 : vector<128x32xf32>
    %10 = arith.addf %5, %9 : vector<128x32xf32>
    %cst_6 = arith.constant 0.797884583 : f32
    %11 = vector.broadcast %cst_6 : f32 to vector<128x32xf32>
    %12 = arith.mulf %11, %10 : vector<128x32xf32>
    %13 = math.tanh %12 : vector<128x32xf32>
    %cst_7 = arith.constant 1.000000e+00 : f32
    %14 = vector.broadcast %cst_7 : f32 to vector<128x32xf32>
    %15 = arith.addf %14, %13 : vector<128x32xf32>
    %cst_8 = arith.constant 5.000000e-01 : f32
    %16 = vector.broadcast %cst_8 : f32 to vector<128x32xf32>
    %17 = arith.mulf %16, %15 : vector<128x32xf32>
    %18 = arith.mulf %5, %17 : vector<128x32xf32>
    %19 = arith.truncf %18 : vector<128x32xf32> to vector<128x32xbf16>
    %c0_9 = arith.constant 0 : index
    %c0_10 = arith.constant 0 : index
    %20 = vector.load %arg4[%c0_9, %c0_10] : memref<16x32xbf16, #tpu.memory_space<vmem>>, vector<16x32xbf16>
    %c0_11 = arith.constant 0 : index
    %c0_12 = arith.constant 0 : index
    %21 = vector.load %arg5[%c0_11, %c0_12] : memref<16x1xf32, #tpu.memory_space<vmem>>, vector<16x1xf32>
    %22 = vector.extract_strided_slice %19 {offsets = [0, 0], sizes = [32, 32], strides = [1, 1]} : vector<128x32xbf16> to vector<32x32xbf16>
    %cst_13 = arith.constant dense<0.000000e+00> : vector<16x32xf32>
    %23 = tpu.matmul %20, %22, %cst_13 {dimension_numbers = #tpu.dot_dimension_numbers<[1], [0], [0], [1], [0, 0, 1, 1], [], []>} : vector<16x32xbf16>, vector<32x32xbf16>, vector<16x32xf32> -> vector<16x32xf32>
    %24 = vector.broadcast %21 : vector<16x1xf32> to vector<16x32xf32>
    %25 = arith.addf %23, %24 : vector<16x32xf32>
    %c0_14 = arith.constant 0 : index
    %c0_15 = arith.constant 0 : index
    %c0_16 = arith.constant 0 : index
    %26 = vector.load %arg6[%c0_14, %c0_15, %c0_16] : memref<4x16x32xf32, #tpu.memory_space<vmem>>, vector<1x16x32xf32>
    %27 = vector.shape_cast %26 : vector<1x16x32xf32> to vector<16x32xf32>
    %28 = vector.shape_cast %25 : vector<16x32xf32> to vector<1x16x32xf32>
    tpu.vector_store %arg6[%c0_14, %c0_15, %c0_16], %28 {strides = array<i32>} : memref<4x16x32xf32, #tpu.memory_space<vmem>>, vector<1x16x32xf32>,
    %29 = vector.extract_strided_slice %19 {offsets = [32, 0], sizes = [32, 32], strides = [1, 1]} : vector<128x32xbf16> to vector<32x32xbf16>
    %cst_17 = arith.constant dense<0.000000e+00> : vector<16x32xf32>
    %30 = tpu.matmul %20, %29, %cst_17 {dimension_numbers = #tpu.dot_dimension_numbers<[1], [0], [0], [1], [0, 0, 1, 1], [], []>} : vector<16x32xbf16>, vector<32x32xbf16>, vector<16x32xf32> -> vector<16x32xf32>
    %31 = vector.broadcast %21 : vector<16x1xf32> to vector<16x32xf32>
    %32 = arith.addf %30, %31 : vector<16x32xf32>
    %c1 = arith.constant 1 : index
    %c0_18 = arith.constant 0 : index
    %c0_19 = arith.constant 0 : index
    %33 = vector.load %arg6[%c1, %c0_18, %c0_19] : memref<4x16x32xf32, #tpu.memory_space<vmem>>, vector<1x16x32xf32>
    %34 = vector.shape_cast %33 : vector<1x16x32xf32> to vector<16x32xf32>
    %35 = vector.shape_cast %32 : vector<16x32xf32> to vector<1x16x32xf32>
    tpu.vector_store %arg6[%c1, %c0_18, %c0_19], %35 {strides = array<i32>} : memref<4x16x32xf32, #tpu.memory_space<vmem>>, vector<1x16x32xf32>,
    %36 = vector.extract_strided_slice %19 {offsets = [64, 0], sizes = [32, 32], strides = [1, 1]} : vector<128x32xbf16> to vector<32x32xbf16>
    %cst_20 = arith.constant dense<0.000000e+00> : vector<16x32xf32>
    %37 = tpu.matmul %20, %36, %cst_20 {dimension_numbers = #tpu.dot_dimension_numbers<[1], [0], [0], [1], [0, 0, 1, 1], [], []>} : vector<16x32xbf16>, vector<32x32xbf16>, vector<16x32xf32> -> vector<16x32xf32>
    %38 = vector.broadcast %21 : vector<16x1xf32> to vector<16x32xf32>
    %39 = arith.addf %37, %38 : vector<16x32xf32>
    %c2 = arith.constant 2 : index
    %c0_21 = arith.constant 0 : index
    %c0_22 = arith.constant 0 : index
    %40 = vector.load %arg6[%c2, %c0_21, %c0_22] : memref<4x16x32xf32, #tpu.memory_space<vmem>>, vector<1x16x32xf32>
    %41 = vector.shape_cast %40 : vector<1x16x32xf32> to vector<16x32xf32>
    %42 = vector.shape_cast %39 : vector<16x32xf32> to vector<1x16x32xf32>
    tpu.vector_store %arg6[%c2, %c0_21, %c0_22], %42 {strides = array<i32>} : memref<4x16x32xf32, #tpu.memory_space<vmem>>, vector<1x16x32xf32>,
    %43 = vector.extract_strided_slice %19 {offsets = [96, 0], sizes = [32, 32], strides = [1, 1]} : vector<128x32xbf16> to vector<32x32xbf16>
    %cst_23 = arith.constant dense<0.000000e+00> : vector<16x32xf32>
    %44 = tpu.matmul %20, %43, %cst_23 {dimension_numbers = #tpu.dot_dimension_numbers<[1], [0], [0], [1], [0, 0, 1, 1], [], []>} : vector<16x32xbf16>, vector<32x32xbf16>, vector<16x32xf32> -> vector<16x32xf32>
    %45 = vector.broadcast %21 : vector<16x1xf32> to vector<16x32xf32>
    %46 = arith.addf %44, %45 : vector<16x32xf32>
    %c3 = arith.constant 3 : index
    %c0_24 = arith.constant 0 : index
    %c0_25 = arith.constant 0 : index
    %47 = vector.load %arg6[%c3, %c0_24, %c0_25] : memref<4x16x32xf32, #tpu.memory_space<vmem>>, vector<1x16x32xf32>
    %48 = vector.shape_cast %47 : vector<1x16x32xf32> to vector<16x32xf32>
    %49 = vector.shape_cast %46 : vector<16x32xf32> to vector<1x16x32xf32>
    tpu.vector_store %arg6[%c3, %c0_24, %c0_25], %49 {strides = array<i32>} : memref<4x16x32xf32, #tpu.memory_space<vmem>>, vector<1x16x32xf32>,
    return
  }
  func.func @transform_0(%arg0: i32) -> (i32, i32) {
    %c0_i32 = arith.constant 0 : i32
    %c0_i32_0 = arith.constant 0 : i32
    return %arg0, %c0_i32 : i32, i32
  }
  func.func @transform_1(%arg0: i32) -> (i32, i32) {
    %c0_i32 = arith.constant 0 : i32
    %c0_i32_0 = arith.constant 0 : i32
    %c0_i32_1 = arith.constant 0 : i32
    return %c0_i32, %c0_i32_0 : i32, i32
  }
  func.func @transform_2(%arg0: i32) -> (i32, i32) {
    %c0_i32 = arith.constant 0 : i32
    %c0_i32_0 = arith.constant 0 : i32
    %c0_i32_1 = arith.constant 0 : i32
    return %c0_i32, %c0_i32_0 : i32, i32
  }
  func.func @transform_3(%arg0: i32) -> (i32, i32) {
    %c0_i32 = arith.constant 0 : i32
    %c0_i32_0 = arith.constant 0 : i32
    %c0_i32_1 = arith.constant 0 : i32
    return %c0_i32, %c0_i32_0 : i32, i32
  }
  func.func @transform_4(%arg0: i32) -> (i32, i32) {
    %c0_i32 = arith.constant 0 : i32
    %c0_i32_0 = arith.constant 0 : i32
    %c0_i32_1 = arith.constant 0 : i32
    return %c0_i32, %c0_i32_0 : i32, i32
  }
  func.func @transform_5(%arg0: i32) -> (i32, i32, i32) {
    %c0_i32 = arith.constant 0 : i32
    %c0_i32_0 = arith.constant 0 : i32
    %c0_i32_1 = arith.constant 0 : i32
    return %arg0, %c0_i32, %c0_i32_0 : i32, i32, i32
  }
}

module attributes {stable_mosaic.version = 11 : i64} {
  func.func @_resmlp_fused_kernel(%arg0: i32, %arg1: memref<128x16xbf16, #tpu.memory_space<vmem>>, %arg2: memref<16x32xbf16, #tpu.memory_space<vmem>>, %arg3: memref<1x32xf32, #tpu.memory_space<vmem>>, %arg4: memref<16x32xbf16, #tpu.memory_space<vmem>>, %arg5: memref<16x1xf32, #tpu.memory_space<vmem>>, %arg6: memref<4x16x32xf32, #tpu.memory_space<vmem>>) attributes {dimension_semantics = [#tpu.dimension_semantics<parallel>], iteration_bounds = array<i64: 2>, scalar_prefetch = 0 : i64, scratch_operands = 0 : i64, tpu.core_type = #tpu.core_type<tc>, window_params = [{transform_indices = @transform_0, window_bounds = array<i64: 128, 16>}, {pipeline_mode = #tpu.pipeline_mode<synchronous>, transform_indices = @transform_1, window_bounds = array<i64: 16, 32>}, {pipeline_mode = #tpu.pipeline_mode<synchronous>, transform_indices = @transform_2, window_bounds = array<i64: 1, 32>}, {pipeline_mode = #tpu.pipeline_mode<synchronous>, transform_indices = @transform_3, window_bounds = array<i64: 16, 32>}, {pipeline_mode = #tpu.pipeline_mode<synchronous>, transform_indices = @transform_4, window_bounds = array<i64: 16, 1>}, {transform_indices = @transform_5, window_bounds = array<i64: 4, 16, 32>}]} {
    %c0 = arith.constant 0 : index
    %c0_0 = arith.constant 0 : index
    %0 = vector.load %arg1[%c0, %c0_0] : memref<128x16xbf16, #tpu.memory_space<vmem>>, vector<128x16xbf16>
    %c0_1 = arith.constant 0 : index
    %c0_2 = arith.constant 0 : index
    %1 = vector.load %arg2[%c0_1, %c0_2] : memref<16x32xbf16, #tpu.memory_space<vmem>>, vector<16x32xbf16>
    %cst = arith.constant dense<0.000000e+00> : vector<128x32xf32>
    %2 = tpu.matmul %0, %1, %cst {dimension_numbers = #tpu.dot_dimension_numbers<[1], [0], [0], [1], [0, 0, 1, 1], [], []>} : vector<128x16xbf16>, vector<16x32xbf16>, vector<128x32xf32> -> vector<128x32xf32>
    %c0_3 = arith.constant 0 : index
    %c0_4 = arith.constant 0 : index
    %3 = vector.load %arg3[%c0_3, %c0_4] : memref<1x32xf32, #tpu.memory_space<vmem>>, vector<1x32xf32>
    %4 = vector.broadcast %3 : vector<1x32xf32> to vector<128x32xf32>
    %5 = arith.addf %2, %4 : vector<128x32xf32>
    %6 = arith.mulf %5, %5 : vector<128x32xf32>
    %7 = arith.mulf %5, %6 : vector<128x32xf32>
    %cst_5 = arith.constant 4.471500e-02 : f32
    %8 = vector.broadcast %cst_5 : f32 to vector<128x32xf32>
    %9 = arith.mulf %8, %7 : vector<128x32xf32>
    %10 = arith.addf %5, %9 : vector<128x32xf32>
    %cst_6 = arith.constant 0.797884583 : f32
    %11 = vector.broadcast %cst_6 : f32 to vector<128x32xf32>
    %12 = arith.mulf %11, %10 : vector<128x32xf32>
    %13 = math.tanh %12 : vector<128x32xf32>
    %cst_7 = arith.constant 1.000000e+00 : f32
    %14 = vector.broadcast %cst_7 : f32 to vector<128x32xf32>
    %15 = arith.addf %14, %13 : vector<128x32xf32>
    %cst_8 = arith.constant 5.000000e-01 : f32
    %16 = vector.broadcast %cst_8 : f32 to vector<128x32xf32>
    %17 = arith.mulf %16, %15 : vector<128x32xf32>
    %18 = arith.mulf %5, %17 : vector<128x32xf32>
    %19 = arith.truncf %18 : vector<128x32xf32> to vector<128x32xbf16>
    %c0_9 = arith.constant 0 : index
    %c0_10 = arith.constant 0 : index
    %20 = vector.load %arg4[%c0_9, %c0_10] : memref<16x32xbf16, #tpu.memory_space<vmem>>, vector<16x32xbf16>
    %c0_11 = arith.constant 0 : index
    %c0_12 = arith.constant 0 : index
    %21 = vector.load %arg5[%c0_11, %c0_12] : memref<16x1xf32, #tpu.memory_space<vmem>>, vector<16x1xf32>
    %22 = vector.extract_strided_slice %19 {offsets = [0, 0], sizes = [32, 32], strides = [1, 1]} : vector<128x32xbf16> to vector<32x32xbf16>
    %cst_13 = arith.constant dense<0.000000e+00> : vector<16x32xf32>
    %23 = tpu.matmul %20, %22, %cst_13 {dimension_numbers = #tpu.dot_dimension_numbers<[1], [0], [0], [1], [0, 0, 1, 1], [], []>} : vector<16x32xbf16>, vector<32x32xbf16>, vector<16x32xf32> -> vector<16x32xf32>
    %24 = vector.broadcast %21 : vector<16x1xf32> to vector<16x32xf32>
    %25 = arith.addf %23, %24 : vector<16x32xf32>
    %c0_14 = arith.constant 0 : index
    %c0_15 = arith.constant 0 : index
    %c0_16 = arith.constant 0 : index
    %26 = vector.load %arg6[%c0_14, %c0_15, %c0_16] : memref<4x16x32xf32, #tpu.memory_space<vmem>>, vector<1x16x32xf32>
    %27 = vector.shape_cast %26 : vector<1x16x32xf32> to vector<16x32xf32>
    %28 = vector.shape_cast %25 : vector<16x32xf32> to vector<1x16x32xf32>
    tpu.vector_store %arg6[%c0_14, %c0_15, %c0_16], %28 {strides = array<i32>} : memref<4x16x32xf32, #tpu.memory_space<vmem>>, vector<1x16x32xf32>,
    %29 = vector.extract_strided_slice %19 {offsets = [32, 0], sizes = [32, 32], strides = [1, 1]} : vector<128x32xbf16> to vector<32x32xbf16>
    %cst_17 = arith.constant dense<0.000000e+00> : vector<16x32xf32>
    %30 = tpu.matmul %20, %29, %cst_17 {dimension_numbers = #tpu.dot_dimension_numbers<[1], [0], [0], [1], [0, 0, 1, 1], [], []>} : vector<16x32xbf16>, vector<32x32xbf16>, vector<16x32xf32> -> vector<16x32xf32>
    %31 = vector.broadcast %21 : vector<16x1xf32> to vector<16x32xf32>
    %32 = arith.addf %30, %31 : vector<16x32xf32>
    %c1 = arith.constant 1 : index
    %c0_18 = arith.constant 0 : index
    %c0_19 = arith.constant 0 : index
    %33 = vector.load %arg6[%c1, %c0_18, %c0_19] : memref<4x16x32xf32, #tpu.memory_space<vmem>>, vector<1x16x32xf32>
    %34 = vector.shape_cast %33 : vector<1x16x32xf32> to vector<16x32xf32>
    %35 = vector.shape_cast %32 : vector<16x32xf32> to vector<1x16x32xf32>
    tpu.vector_store %arg6[%c1, %c0_18, %c0_19], %35 {strides = array<i32>} : memref<4x16x32xf32, #tpu.memory_space<vmem>>, vector<1x16x32xf32>,
    %36 = vector.extract_strided_slice %19 {offsets = [64, 0], sizes = [32, 32], strides = [1, 1]} : vector<128x32xbf16> to vector<32x32xbf16>
    %cst_20 = arith.constant dense<0.000000e+00> : vector<16x32xf32>
    %37 = tpu.matmul %20, %36, %cst_20 {dimension_numbers = #tpu.dot_dimension_numbers<[1], [0], [0], [1], [0, 0, 1, 1], [], []>} : vector<16x32xbf16>, vector<32x32xbf16>, vector<16x32xf32> -> vector<16x32xf32>
    %38 = vector.broadcast %21 : vector<16x1xf32> to vector<16x32xf32>
    %39 = arith.addf %37, %38 : vector<16x32xf32>
    %c2 = arith.constant 2 : index
    %c0_21 = arith.constant 0 : index
    %c0_22 = arith.constant 0 : index
    %40 = vector.load %arg6[%c2, %c0_21, %c0_22] : memref<4x16x32xf32, #tpu.memory_space<vmem>>, vector<1x16x32xf32>
    %41 = vector.shape_cast %40 : vector<1x16x32xf32> to vector<16x32xf32>
    %42 = vector.shape_cast %39 : vector<16x32xf32> to vector<1x16x32xf32>
    tpu.vector_store %arg6[%c2, %c0_21, %c0_22], %42 {strides = array<i32>} : memref<4x16x32xf32, #tpu.memory_space<vmem>>, vector<1x16x32xf32>,
    %43 = vector.extract_strided_slice %19 {offsets = [96, 0], sizes = [32, 32], strides = [1, 1]} : vector<128x32xbf16> to vector<32x32xbf16>
    %cst_23 = arith.constant dense<0.000000e+00> : vector<16x32xf32>
    %44 = tpu.matmul %20, %43, %cst_23 {dimension_numbers = #tpu.dot_dimension_numbers<[1], [0], [0], [1], [0, 0, 1, 1], [], []>} : vector<16x32xbf16>, vector<32x32xbf16>, vector<16x32xf32> -> vector<16x32xf32>
    %45 = vector.broadcast %21 : vector<16x1xf32> to vector<16x32xf32>
    %46 = arith.addf %44, %45 : vector<16x32xf32>
    %c3 = arith.constant 3 : index
    %c0_24 = arith.constant 0 : index
    %c0_25 = arith.constant 0 : index
    %47 = vector.load %arg6[%c3, %c0_24, %c0_25] : memref<4x16x32xf32, #tpu.memory_space<vmem>>, vector<1x16x32xf32>
    %48 = vector.shape_cast %47 : vector<1x16x32xf32> to vector<16x32xf32>
    %49 = vector.shape_cast %46 : vector<16x32xf32> to vector<1x16x32xf32>
    tpu.vector_store %arg6[%c3, %c0_24, %c0_25], %49 {strides = array<i32>} : memref<4x16x32xf32, #tpu.memory_space<vmem>>, vector<1x16x32xf32>,
    return
  }
  func.func @transform_0(%arg0: i32) -> (i32, i32) {
    %c0_i32 = arith.constant 0 : i32
    %c0_i32_0 = arith.constant 0 : i32
    return %arg0, %c0_i32 : i32, i32
  }
  func.func @transform_1(%arg0: i32) -> (i32, i32) {
    %c0_i32 = arith.constant 0 : i32
    %c0_i32_0 = arith.constant 0 : i32
    %c0_i32_1 = arith.constant 0 : i32
    return %c0_i32, %c0_i32_0 : i32, i32
  }
  func.func @transform_2(%arg0: i32) -> (i32, i32) {
    %c0_i32 = arith.constant 0 : i32
    %c0_i32_0 = arith.constant 0 : i32
    %c0_i32_1 = arith.constant 0 : i32
    return %c0_i32, %c0_i32_0 : i32, i32
  }
  func.func @transform_3(%arg0: i32) -> (i32, i32) {
    %c0_i32 = arith.constant 0 : i32
    %c0_i32_0 = arith.constant 0 : i32
    %c0_i32_1 = arith.constant 0 : i32
    return %c0_i32, %c0_i32_0 : i32, i32
  }
  func.func @transform_4(%arg0: i32) -> (i32, i32) {
    %c0_i32 = arith.constant 0 : i32
    %c0_i32_0 = arith.constant 0 : i32
    %c0_i32_1 = arith.constant 0 : i32
    return %c0_i32, %c0_i32_0 : i32, i32
  }
  func.func @transform_5(%arg0: i32) -> (i32, i32, i32) {
    %c0_i32 = arith.constant 0 : i32
    %c0_i32_0 = arith.constant 0 : i32
    %c0_i32_1 = arith.constant 0 : i32
    return %arg0, %c0_i32, %c0_i32_0 : i32, i32, i32
  }
}

</mosaic_0001>

<bundles_post_ra>
// kernel: _resmlp_forward_impl.1
= control target key start
LH: loop header
LB: loop body
LE: loop exit
PB: predicated region body
PF: predicated region fallthrough
CT: control target
= control target key end

     0   :  { %s1040_s18 = smov 0   ;;  %s1261_s0 = inlined_call_operand.vmem [shape: bf16[256,16], index: 0, kind: input, shape index: {}]   ;;  %s1262_s1 = inlined_call_operand.vmem [shape: bf16[16,32], index: 1, kind: input, shape index: {}]   ;;  %s1263_s2 = inlined_call_operand.vmem [shape: f32[1,32], index: 2, kind: input, shape index: {}]   ;;  %s1264_s3 = inlined_call_operand.vmem [shape: bf16[16,32], index: 3, kind: input, shape index: {}]   ;;  %s1265_s4 = inlined_call_operand.vmem [shape: f32[16,1], index: 4, kind: input, shape index: {}]   ;;  %s1266_s5 = inlined_call_operand.vmem [shape: f32[8,16,32], index: 5, kind: output, shape index: {}]  }
   0x1 LB: > { %s832_s19 = sadd.s32 4294967295, %s1005_s18   ;;  %p836_p0 = scmp.ge.s32.totalorder %s1005_s18, 1  ;;  %s1005_s18 = sphi %s1040_s18, %s15_s18  }
   0x2   : > { %p188_p1 = scmp.lt.s32.totalorder %s1005_s18, 3 }
   0x4   : > { %p189_p2 = pnand %p836_p0, %p188_p1 }
   0x5   : > { %v957_v0 = vld [vmem:[%s1262_s1] sm:$0xff] (!%p189_p2)   ;;  %s837_s22 = sshll.u32 (!%p189_p2), %s832_s19, 4  ;;  %vm302_vm0 = vcmask (!%p189_p2), 130048   ;;  %v1007_v9 = vmov (!%p189_p2), 0.0   ;;  %vm1008_vm1 = vmmov (!%p189_p2), 0   ;;  %v1009_v11 = vmov (!%p189_p2), 0  }
   0x6   : > { %192 = sbr.rel (%p189_p2) target bundleno = 521 (0x209), region = 40  ;;  %p218_p3 = scmp.lt.s32.totalorder (!%p189_p2), %s837_s22, 31  ;;  %895 = vmatprep.subr.bf16.mxu0 (!%p189_p2), %v957_v0  ;;  %913 = vmatprep.subr.bf16.mxu1 (!%p189_p2), %v1007_v9  ;;  %v578_v10 = vld [vmem:[%s1265_s4] sm:$0xff] (!%p189_p2)  ;;  %v579_v12 = vld [vmem:[%s1265_s4 + $0x8] sm:$0xff] (!%p189_p2)  ;;  %vm595_vm2 = vcmask (!%p189_p2), 261120  }
   0x7   : > { %896 = vmatpush3.bf16.msra.mxu0 (!%p189_p2), %v957_v0  ;;  %917 = vmatprep.mubr.msk.bf16.mxu1 (!%p189_p2), %vm1008_vm1, %v1007_v9  ;;  %v1076_v13 = vld [vmem:[%s1263_s2] ss:$0 sm:$0xff] (!%p189_p2)  ;;  %s839_s10 = sshll.u32 (!%p189_p2), %s832_s19, 2 }
   0x8   : > { %956 = vset.pattern.permute.xlu0 (!%p189_p2), %v1009_v11  ;;  %p224_p4 = scmp.lt.s32.totalorder (!%p189_p2), %s839_s10, 7 }
   0x9   : > { %582 = vperm.xlu0 (!%p189_p2), %956, %v578_v10  }
   0xd   : > { %s1268_s22 = smov (!%p218_p3, %s837_s22), 31  ;;  %587 = vperm.xlu0 %956, %v579_v12   ;;  %s1270_s10 = smov (!%p224_p4, %s839_s10), 7 }
   0xe   : > { %s838_s23 = sshll.u32 %s1268_s22, 2  ;;  %s873_s11 = sshll.u32 %s1270_s10, 4 }
   0xf   : > { %s221_s26 = scalar_lea.vmem %s1261_s0, %s838_s23  ;;  %s1240_s14 = scalar_lea.vmem %s1266_s5, %s873_s11 }
  0x10   : > { %v958_v1 = vld [vmem:[%s221_s26] sm:$0xff]   ;;  %v959_v2 = vld [vmem:[%s221_s26 + $0x8] sm:$0xff]   ;;  %v960_v3 = vld [vmem:[%s221_s26 + $0x10] sm:$0xff]  }
  0x11   : > { %897 = vmatprep.mubr.msk.bf16.mxu0 %vm302_vm0, %v958_v1  ;;  %v961_v4 = vld [vmem:[%s221_s26 + $0x18] sm:$0xff]   ;;  %v962_v5 = vld [vmem:[%s221_s26 + $0x20] sm:$0xff]   ;;  %v963_v6 = vld [vmem:[%s221_s26 + $0x28] sm:$0xff]  }
  0x12   : > { %898 = vmatmul.mubr.msk.bf16.vlgmr.msra.gmra.mrb[0].mxu0 %vm302_vm0, %v959_v2  ;;  %v964_v7 = vld [vmem:[%s221_s26 + $0x30] sm:$0xff]   ;;  %v965_v8 = vld [vmem:[%s221_s26 + $0x38] sm:$0xff]  }
  0x13   : > { %901 = vmatprep.mubr.msk.bf16.mxu0 %vm302_vm0, %v960_v3 }
  0x1a   : > { %902 = vmatmul.mubr.msk.bf16.gmra.mrb[4].mxu0 %vm302_vm0, %v961_v4 }
  0x1b   : > { %905 = vmatprep.mubr.msk.bf16.mxu0 %vm302_vm0, %v962_v5 }
  0x22   : > { %906 = vmatmul.mubr.msk.bf16.gmra.mrb[8].mxu0 %vm302_vm0, %v963_v6 }
  0x23   : > { %909 = vmatprep.mubr.msk.bf16.mxu0 %vm302_vm0, %v964_v7 }
  0x2a   : > { %910 = vmatmul.mubr.msk.bf16.gmra.mrb[12].mxu0 %vm302_vm0, %v965_v8 }
  0xe5   : > { %v899_v14 = vpop.f32.mrb[0].mxu0 }
  0xe6   : > { %v1079_v15 = vadd.f32 %v899_v14, %v1076_v13  ;;  %v361_v16 = vpop.f32.mrb[1].mxu0 }
  0xe7   : > { %v1082_v17 = vadd.f32 %v1076_v13, %v361_v16  ;;  %v900_v18 = vpop.f32.mrb[2].mxu0 }
  0xe8   : > { %v426_v19 = vmul.f32 %v1079_v15, %v1079_v15  ;;  %v1087_v20 = vadd.f32 %v900_v18, %v1076_v13  ;;  %v364_v21 = vpop.f32.mrb[3].mxu0 }
  0xe9   : > { %v424_v22 = vmul.f32 %v1082_v17, %v1082_v17  ;;  %v1092_v23 = vadd.f32 %v1076_v13, %v364_v21 }
  0xea   : > { %v442_v24 = vmul.f32 %v426_v19, %v1079_v15  ;;  %v427_v25 = vmul.f32 %v1087_v20, %v1087_v20 }
  0xeb   : > { %v440_v26 = vmul.f32 %v424_v22, %v1082_v17  ;;  %v425_v27 = vmul.f32 %v1092_v23, %v1092_v23 }
  0xec   : > { %v458_v28 = vmul.f32 0.044715, %v442_v24  ;;  %v443_v29 = vmul.f32 %v427_v25, %v1087_v20 }
  0xed   : > { %v456_v30 = vmul.f32 0.044715, %v440_v26  ;;  %v441_v31 = vmul.f32 %v425_v27, %v1092_v23  ;;  %v903_v32 = vpop.f32.mrb[4].mxu0 }
  0xee   : > { %v474_v33 = vadd.f32 %v458_v28, %v1079_v15  ;;  %v459_v34 = vmul.f32 0.044715, %v443_v29  ;;  %v1104_v35 = vadd.f32 %v903_v32, %v1076_v13  ;;  %v377_v36 = vpop.f32.mrb[5].mxu0 }
  0xef   : > { %v472_v37 = vadd.f32 %v456_v30, %v1082_v17  ;;  %v457_v38 = vmul.f32 0.044715, %v441_v31  ;;  %v1108_v39 = vadd.f32 %v1076_v13, %v377_v36  ;;  %v904_v40 = vpop.f32.mrb[6].mxu0 }
  0xf0   : > { %v490_v41 = vmul.f32 0.7978846, %v474_v33  ;;  %v475_v42 = vadd.f32 %v459_v34, %v1087_v20  ;;  %v430_v43 = vmul.f32 %v1104_v35, %v1104_v35  ;;  %v1114_v44 = vadd.f32 %v904_v40, %v1076_v13  ;;  %v380_v45 = vpop.f32.mrb[7].mxu0 }
  0xf1   : > { %v488_v46 = vmul.f32 0.7978846, %v472_v37  ;;  %v473_v47 = vadd.f32 %v457_v38, %v1092_v23  ;;  %v428_v48 = vmul.f32 %v1108_v39, %v1108_v39  ;;  %v1120_v49 = vadd.f32 %v1076_v13, %v380_v45 }
  0xf2   : > { %967 = vtanh.f32 %v490_v41  ;;  %v491_v50 = vmul.f32 0.7978846, %v475_v42  ;;  %v446_v51 = vmul.f32 %v430_v43, %v1104_v35  ;;  %v431_v52 = vmul.f32 %v1114_v44, %v1114_v44 }
  0xf3   : > { %v489_v53 = vmul.f32 0.7978846, %v473_v47  ;;  %v444_v54 = vmul.f32 %v428_v48, %v1108_v39  ;;  %v429_v55 = vmul.f32 %v1120_v49, %v1120_v49  ;;  %969 = vtanh.f32 %v488_v46 }
  0xf4   : > { %971 = vtanh.f32 %v491_v50  ;;  %v462_v56 = vmul.f32 0.044715, %v446_v51  ;;  %v447_v57 = vmul.f32 %v431_v52, %v1114_v44 }
  0xf5   : > { %v460_v58 = vmul.f32 0.044715, %v444_v54  ;;  %v445_v59 = vmul.f32 %v429_v55, %v1120_v49  ;;  %v907_v60 = vpop.f32.mrb[8].mxu0  ;;  %973 = vtanh.f32 %v489_v53 }
  0xf6   : > { %v478_v61 = vadd.f32 %v462_v56, %v1104_v35  ;;  %v463_v62 = vmul.f32 0.044715, %v447_v57  ;;  %v1132_v63 = vadd.f32 %v907_v60, %v1076_v13  ;;  %v393_v0 = vpop.f32.mrb[9].mxu0 }
  0xf7   : > { %v476_v1 = vadd.f32 %v460_v58, %v1108_v39  ;;  %v461_v2 = vmul.f32 0.044715, %v445_v59  ;;  %v1136_v3 = vadd.f32 %v1076_v13, %v393_v0  ;;  %v908_v4 = vpop.f32.mrb[10].mxu0 }
  0xf8   : > { %v494_v5 = vmul.f32 0.7978846, %v478_v61  ;;  %v479_v6 = vadd.f32 %v463_v62, %v1114_v44  ;;  %v434_v7 = vmul.f32 %v1132_v63, %v1132_v63  ;;  %v1142_v8 = vadd.f32 %v908_v4, %v1076_v13  ;;  %v396_v10 = vpop.f32.mrb[11].mxu0 }
  0xf9   : > { %v492_v11 = vmul.f32 0.7978846, %v476_v1  ;;  %v477_v12 = vadd.f32 %v461_v2, %v1120_v49  ;;  %v432_v14 = vmul.f32 %v1136_v3, %v1136_v3  ;;  %v1148_v16 = vadd.f32 %v1076_v13, %v396_v10 }
  0xfa   : > { %975 = vtanh.f32 %v494_v5  ;;  %v495_v18 = vmul.f32 0.7978846, %v479_v6  ;;  %v450_v19 = vmul.f32 %v434_v7, %v1132_v63  ;;  %v435_v21 = vmul.f32 %v1142_v8, %v1142_v8 }
  0xfb   : > { %977 = vtanh.f32 %v492_v11  ;;  %v493_v22 = vmul.f32 0.7978846, %v477_v12  ;;  %v448_v24 = vmul.f32 %v432_v14, %v1136_v3  ;;  %v433_v25 = vmul.f32 %v1148_v16, %v1148_v16 }
  0xfc   : > { %v968_v26 = vpop.eup %967  ;;  %979 = vtanh.f32 %v495_v18  ;;  %v466_v27 = vmul.f32 0.044715, %v450_v19  ;;  %v451_v28 = vmul.f32 %v435_v21, %v1142_v8 }
  0xfd   : > { %v970_v29 = vpop.eup %969  ;;  %981 = vtanh.f32 %v493_v22  ;;  %v464_v30 = vmul.f32 0.044715, %v448_v24  ;;  %v449_v31 = vmul.f32 %v433_v25, %v1148_v16  ;;  %v911_v32 = vpop.f32.mrb[12].mxu0  ;;  %v1158_v33 = vadd.f32 1.0, %v968_v26 }
  0xfe   : > { %v972_v34 = vpop.eup %971  ;;  %v482_v36 = vadd.f32 %v466_v27, %v1132_v63  ;;  %v467_v37 = vmul.f32 0.044715, %v451_v28  ;;  %v1162_v38 = vadd.f32 %v911_v32, %v1076_v13  ;;  %v409_v40 = vpop.f32.mrb[13].mxu0  ;;  %v520_v41 = vadd.f32 1.0, %v970_v29 }
  0xff   : > { %v480_v42 = vadd.f32 %v464_v30, %v1136_v3  ;;  %v465_v43 = vmul.f32 0.044715, %v449_v31  ;;  %v1166_v45 = vadd.f32 %v1076_v13, %v409_v40  ;;  %v912_v46 = vpop.f32.mrb[14].mxu0  ;;  %v1168_v47 = vadd.f32 1.0, %v972_v34  ;;  %v974_v54 = vpop.eup %973 }
 0x100   : > { %v498_v48 = vmul.f32 0.7978846, %v482_v36  ;;  %v483_v50 = vadd.f32 %v467_v37, %v1142_v8  ;;  %v438_v51 = vmul.f32 %v1162_v38, %v1162_v38  ;;  %v1174_v52 = vadd.f32 %v912_v46, %v1076_v13  ;;  %v412_v53 = vpop.f32.mrb[15].mxu0 }
 0x101   : > { %v496_v55 = vmul.f32 0.7978846, %v480_v42  ;;  %v481_v56 = vadd.f32 %v465_v43, %v1148_v16  ;;  %v436_v57 = vmul.f32 %v1166_v45, %v1166_v45  ;;  %v1180_v58 = vadd.f32 %v1076_v13, %v412_v53 }
 0x102   : > { %983 = vtanh.f32 %v498_v48  ;;  %v499_v59 = vmul.f32 0.7978846, %v483_v50  ;;  %v454_v60 = vmul.f32 %v438_v51, %v1162_v38  ;;  %v439_v61 = vmul.f32 %v1174_v52, %v1174_v52 }
 0x103   : > { %985 = vtanh.f32 %v496_v55  ;;  %v497_v62 = vmul.f32 0.7978846, %v481_v56  ;;  %v452_v0 = vmul.f32 %v436_v57, %v1166_v45  ;;  %v437_v1 = vmul.f32 %v1180_v58, %v1180_v58 }
 0x104   : > { %v976_v2 = vpop.eup %975  ;;  %987 = vtanh.f32 %v499_v59  ;;  %v470_v4 = vmul.f32 0.044715, %v454_v60  ;;  %v455_v13 = vmul.f32 %v439_v61, %v1174_v52  ;;  %v521_v5 = vadd.f32 1.0, %v974_v54 }
 0x105   : > { %v978_v6 = vpop.eup %977  ;;  %v526_v7 = vadd.f32 1.0, %v976_v2  ;;  %989 = vtanh.f32 %v497_v62  ;;  %v468_v10 = vmul.f32 0.044715, %v452_v0  ;;  %v453_v11 = vmul.f32 %v437_v1, %v1180_v58 }
 0x106   : > { %v980_v12 = vpop.eup %979  ;;  %v524_v14 = vadd.f32 1.0, %v978_v6  ;;  %v486_v18 = vadd.f32 %v470_v4, %v1162_v38  ;;  %v471_v19 = vmul.f32 0.044715, %v455_v13  ;;  %v536_v21 = vmul.f32 0.5, %v520_v41 }
 0x107   : > { %v982_v22 = vpop.eup %981  ;;  %v542_v24 = vmul.f32 0.5, %v526_v7  ;;  %v527_v25 = vadd.f32 1.0, %v980_v12  ;;  %v484_v26 = vadd.f32 %v468_v10, %v1166_v45  ;;  %v469_v27 = vmul.f32 0.044715, %v453_v11 }
 0x108   : > { %v540_v28 = vmul.f32 0.5, %v524_v14  ;;  %v525_v29 = vadd.f32 1.0, %v982_v22  ;;  %v502_v30 = vmul.f32 0.7978846, %v486_v18  ;;  %v487_v31 = vadd.f32 %v471_v19, %v1174_v52 }
 0x109   : > { %v1194_v32 = vmul.f32 %v542_v24, %v1104_v35  ;;  %v543_v34 = vmul.f32 0.5, %v527_v25  ;;  %v500_v36 = vmul.f32 0.7978846, %v484_v26  ;;  %v485_v37 = vadd.f32 %v469_v27, %v1180_v58 }
 0x10a   : > { %v556_v40 = vmul.f32 %v540_v28, %v1108_v39  ;;  %v541_v41 = vmul.f32 0.5, %v525_v29  ;;  %991 = vtanh.f32 %v502_v30  ;;  %v503_v42 = vmul.f32 0.7978846, %v487_v31 }
 0x10b   : > { %v559_v43 = vmul.f32 %v543_v34, %v1114_v44  ;;  %993 = vtanh.f32 %v500_v36  ;;  %v501_v46 = vmul.f32 0.7978846, %v485_v37  ;;  %v537_v48 = vmul.f32 0.5, %v521_v5 }
 0x10c   : > { %v984_v50 = vpop.eup %983  ;;  %v557_v51 = vmul.f32 %v541_v41, %v1120_v49  ;;  %995 = vtanh.f32 %v503_v42  ;;  %v552_v35 = vmul.f32 %v536_v21, %v1082_v17  ;;  %v538_v53 = vmul.f32 0.5, %v1158_v33 }
 0x10d   : > { %v986_v54 = vpop.eup %985  ;;  %v530_v55 = vadd.f32 1.0, %v984_v50  ;;  %997 = vtanh.f32 %v501_v46  ;;  %v553_v39 = vmul.f32 %v537_v48, %v1092_v23  ;;  %v539_v56 = vmul.f32 0.5, %v1168_v47 }
 0x10e   : > { %v988_v57 = vpop.eup %987  ;;  %v528_v44 = vadd.f32 1.0, %v986_v54  ;;  %v554_v59 = vmul.f32 %v538_v53, %v1079_v15  ;;  %v570_v60 = vpack.c.bf16 %v557_v51, %v556_v40  ;;  %v571_v61 = vpack.c.bf16 %v559_v43, %v1194_v32 }
 0x10f   : > { %v990_v49 = vpop.eup %989  ;;  %v546_v62 = vmul.f32 0.5, %v530_v55  ;;  %v531_v0 = vadd.f32 1.0, %v988_v57  ;;  %v568_v17 = vpack.c.bf16 %v553_v39, %v552_v35  ;;  %v555_v33 = vmul.f32 %v539_v56, %v1087_v20  ;;  %v966_v20 = vld [vmem:[%s1264_s3] sm:$0xff]  }
 0x110   : > { %v544_v1 = vmul.f32 0.5, %v528_v44  ;;  %v529_v2 = vadd.f32 1.0, %v990_v49 }
 0x111   : > { %v547_v4 = vmul.f32 0.5, %v531_v0  ;;  %914 = vmatpush3.bf16.msra.mxu1 %v568_v17  ;;  %v569_v23 = vpack.c.bf16 %v555_v33, %v554_v59  ;;  %v562_v47 = vmul.f32 %v546_v62, %v1132_v63 }
 0x112   : > { %v545_v13 = vmul.f32 0.5, %v529_v2  ;;  %915 = vmatprep.subr.bf16.mxu1 %v1007_v9  ;;  %v560_v6 = vmul.f32 %v544_v1, %v1136_v3 }
 0x113   : > { %v563_v15 = vmul.f32 %v547_v4, %v1142_v8 }
 0x114   : > { %v992_v5 = vpop.eup %991  ;;  %v561_v7 = vmul.f32 %v545_v13, %v1148_v16 }
 0x115   : > { %v994_v10 = vpop.eup %993  ;;  %v534_v11 = vadd.f32 1.0, %v992_v5  ;;  %916 = vmatpush3.bf16.msra.mxu1 %v569_v23  ;;  %v573_v12 = vpack.c.bf16 %v563_v15, %v562_v47 }
 0x116   : > { %v996_v14 = vpop.eup %995  ;;  %v532_v18 = vadd.f32 1.0, %v994_v10  ;;  %921 = vmatprep.subr.bf16.mxu1 %v1007_v9  ;;  %v572_v63 = vpack.c.bf16 %v561_v7, %v560_v6 }
 0x117   : > { %v998_v8 = vpop.eup %997  ;;  %v550_v19 = vmul.f32 0.5, %v534_v11  ;;  %v535_v21 = vadd.f32 1.0, %v996_v14 }
 0x118   : > { %v548_v3 = vmul.f32 0.5, %v532_v18  ;;  %v533_v22 = vadd.f32 1.0, %v998_v8  ;;  %918 = vmatmul.mubr.msk.bf16.vlgmr.msra.gmra.mrb[0].mxu1 %vm595_vm2, %v966_v20 }
 0x119   : > { %v551_v16 = vmul.f32 0.5, %v535_v21  ;;  %922 = vmatpush3.bf16.msra.mxu1 %v570_v60  ;;  %925 = vmatprep.mubr.msk.bf16.mxu1 %vm1008_vm1, %v1007_v9  ;;  %v566_v25 = vmul.f32 %v550_v19, %v1162_v38  ;;  %v583_v38 = vpop.permute.xlu0 %582 }
 0x11a   : > { %v549_v24 = vmul.f32 0.5, %v533_v22  ;;  %923 = vmatprep.subr.bf16.mxu1 %v1007_v9  ;;  %v564_v27 = vmul.f32 %v548_v3, %v1166_v45 }
 0x11b   : > { %v567_v26 = vmul.f32 %v551_v16, %v1174_v52 }
 0x11c   : > { %v565_v28 = vmul.f32 %v549_v24, %v1180_v58 }
 0x11d   : > { %924 = vmatpush3.bf16.msra.mxu1 %v571_v61  ;;  %v575_v29 = vpack.c.bf16 %v567_v26, %v566_v25 }
 0x11e   : > { %929 = vmatprep.subr.bf16.mxu1 %v1007_v9  ;;  %v574_v30 = vpack.c.bf16 %v565_v28, %v564_v27 }
 0x120   : > { %926 = vmatmul.mubr.msk.bf16.vlgmr.msra.gmra.mrb[4].mxu1 %vm595_vm2, %v966_v20 }
 0x121   : > { %930 = vmatpush3.bf16.msra.mxu1 %v572_v63  ;;  %933 = vmatprep.mubr.msk.bf16.mxu1 %vm1008_vm1, %v1007_v9 }
 0x122   : > { %931 = vmatprep.subr.bf16.mxu1 %v1007_v9 }
 0x125   : > { %932 = vmatpush3.bf16.msra.mxu1 %v573_v12 }
 0x126   : > { %937 = vmatprep.subr.bf16.mxu1 %v1007_v9 }
 0x128   : > { %934 = vmatmul.mubr.msk.bf16.vlgmr.msra.gmra.mrb[8].mxu1 %vm595_vm2, %v966_v20 }
 0x129   : > { %938 = vmatpush3.bf16.msra.mxu1 %v574_v30  ;;  %941 = vmatprep.mubr.msk.bf16.mxu1 %vm1008_vm1, %v1007_v9 }
 0x12a   : > { %939 = vmatprep.subr.bf16.mxu1 %v1007_v9  ;;  %v588_v9 = vpop.permute.xlu0 %587 }
 0x12d   : > { %940 = vmatpush3.bf16.msra.mxu1 %v575_v29 }
 0x130   : > { %942 = vmatmul.mubr.msk.bf16.vlgmr.msra.gmra.mrb[12].mxu1 %vm595_vm2, %v966_v20 }
 0x1eb   : > { %v633_v45 = vpop.f32.mrb[0].mxu1 }
 0x1ec   : > { %v634_v52 = vadd.f32 %v633_v45, %v583_v38  ;;  %v919_v58 = vpop.f32.mrb[1].mxu1 }
 0x1ed   : > { %v636_v31 = vpop.f32.mrb[2].mxu1 }
 0x1ee   : > { %640 = vst.msk [vmem:[%s1240_s14] sm:$0xff] %vm595_vm2, %v634_v52  ;;  %v637_v32 = vadd.f32 %v636_v31, %v588_v9  ;;  %v920_v34 = vpop.f32.mrb[3].mxu1 }
 0x1f0   : > { %641 = vst.msk [vmem:[%s1240_s14 + $0x8] sm:$0xff] %vm595_vm2, %v637_v32 }
 0x1f3   : > { %v676_v36 = vpop.f32.mrb[4].mxu1 }
 0x1f4   : > { %v677_v37 = vadd.f32 %v676_v36, %v583_v38  ;;  %v927_v40 = vpop.f32.mrb[5].mxu1 }
 0x1f5   : > { %v679_v41 = vpop.f32.mrb[6].mxu1 }
 0x1f6   : > { %863 = vst.msk [vmem:[%s1240_s14 + $0x10] sm:$0xff] %vm595_vm2, %v677_v37  ;;  %v680_v42 = vadd.f32 %v679_v41, %v588_v9  ;;  %v928_v43 = vpop.f32.mrb[7].mxu1 }
 0x1f8   : > { %864 = vst.msk [vmem:[%s1240_s14 + $0x18] sm:$0xff] %vm595_vm2, %v680_v42 }
 0x1fb   : > { %v720_v46 = vpop.f32.mrb[8].mxu1 }
 0x1fc   : > { %v721_v48 = vadd.f32 %v720_v46, %v583_v38  ;;  %v935_v50 = vpop.f32.mrb[9].mxu1 }
 0x1fd   : > { %v723_v51 = vpop.f32.mrb[10].mxu1 }
 0x1fe   : > { %866 = vst.msk [vmem:[%s1240_s14 + $0x20] sm:$0xff] %vm595_vm2, %v721_v48  ;;  %v724_v35 = vadd.f32 %v723_v51, %v588_v9  ;;  %v936_v53 = vpop.f32.mrb[11].mxu1 }
 0x200   : > { %867 = vst.msk [vmem:[%s1240_s14 + $0x28] sm:$0xff] %vm595_vm2, %v724_v35 }
 0x203   : > { %v764_v54 = vpop.f32.mrb[12].mxu1 }
 0x204   : > { %v765_v55 = vadd.f32 %v764_v54, %v583_v38  ;;  %v943_v39 = vpop.f32.mrb[13].mxu1 }
 0x205   : > { %v767_v56 = vpop.f32.mrb[14].mxu1 }
 0x206   : > { %869 = vst.msk [vmem:[%s1240_s14 + $0x30] sm:$0xff] %vm595_vm2, %v765_v55  ;;  %v768_v57 = vadd.f32 %v767_v56, %v588_v9  ;;  %v944_v44 = vpop.f32.mrb[15].mxu1 }
 0x208   : > { %870 = vst.msk [vmem:[%s1240_s14 + $0x38] sm:$0xff] %vm595_vm2, %v768_v57 }
 0x209 PF: > { %s15_s18 = sadd.s32 1, %s1005_s18  }
 0x20a   : > { %p12_p5 = scmp.ge.s32.totalorder %s15_s18, 4  }
 0x20c   :  { %14 = sbr.rel (!%p12_p5) target bundleno = 1 (0x1), region = 73 }

// kernel: _resmlp_forward_impl.1
= control target key start
LH: loop header
LB: loop body
LE: loop exit
PB: predicated region body
PF: predicated region fallthrough
CT: control target
= control target key end

     0   :  { %s1040_s18 = smov 0   ;;  %s1261_s0 = inlined_call_operand.vmem [shape: bf16[256,16], index: 0, kind: input, shape index: {}]   ;;  %s1262_s1 = inlined_call_operand.vmem [shape: bf16[16,32], index: 1, kind: input, shape index: {}]   ;;  %s1263_s2 = inlined_call_operand.vmem [shape: f32[1,32], index: 2, kind: input, shape index: {}]   ;;  %s1264_s3 = inlined_call_operand.vmem [shape: bf16[16,32], index: 3, kind: input, shape index: {}]   ;;  %s1265_s4 = inlined_call_operand.vmem [shape: f32[16,1], index: 4, kind: input, shape index: {}]   ;;  %s1266_s5 = inlined_call_operand.vmem [shape: f32[8,16,32], index: 5, kind: output, shape index: {}]  }
   0x1 LB: > { %s832_s19 = sadd.s32 4294967295, %s1005_s18   ;;  %p836_p0 = scmp.ge.s32.totalorder %s1005_s18, 1  ;;  %s1005_s18 = sphi %s1040_s18, %s15_s18  }
   0x2   : > { %p188_p1 = scmp.lt.s32.totalorder %s1005_s18, 3 }
   0x4   : > { %p189_p2 = pnand %p836_p0, %p188_p1 }
   0x5   : > { %v957_v0 = vld [vmem:[%s1262_s1] sm:$0xff] (!%p189_p2)   ;;  %s837_s22 = sshll.u32 (!%p189_p2), %s832_s19, 4  ;;  %vm302_vm0 = vcmask (!%p189_p2), 130048   ;;  %v1007_v9 = vmov (!%p189_p2), 0.0   ;;  %vm1008_vm1 = vmmov (!%p189_p2), 0   ;;  %v1009_v11 = vmov (!%p189_p2), 0  }
   0x6   : > { %192 = sbr.rel (%p189_p2) target bundleno = 521 (0x209), region = 40  ;;  %p218_p3 = scmp.lt.s32.totalorder (!%p189_p2), %s837_s22, 31  ;;  %895 = vmatprep.subr.bf16.mxu0 (!%p189_p2), %v957_v0  ;;  %913 = vmatprep.subr.bf16.mxu1 (!%p189_p2), %v1007_v9  ;;  %v578_v10 = vld [vmem:[%s1265_s4] sm:$0xff] (!%p189_p2)  ;;  %v579_v12 = vld [vmem:[%s1265_s4 + $0x8] sm:$0xff] (!%p189_p2)  ;;  %vm595_vm2 = vcmask (!%p189_p2), 261120  }
   0x7   : > { %896 = vmatpush3.bf16.msra.mxu0 (!%p189_p2), %v957_v0  ;;  %917 = vmatprep.mubr.msk.bf16.mxu1 (!%p189_p2), %vm1008_vm1, %v1007_v9  ;;  %v1076_v13 = vld [vmem:[%s1263_s2] ss:$0 sm:$0xff] (!%p189_p2)  ;;  %s839_s10 = sshll.u32 (!%p189_p2), %s832_s19, 2 }
   0x8   : > { %956 = vset.pattern.permute.xlu0 (!%p189_p2), %v1009_v11  ;;  %p224_p4 = scmp.lt.s32.totalorder (!%p189_p2), %s839_s10, 7 }
   0x9   : > { %582 = vperm.xlu0 (!%p189_p2), %956, %v578_v10  }
   0xd   : > { %s1268_s22 = smov (!%p218_p3, %s837_s22), 31  ;;  %587 = vperm.xlu0 %956, %v579_v12   ;;  %s1270_s10 = smov (!%p224_p4, %s839_s10), 7 }
   0xe   : > { %s838_s23 = sshll.u32 %s1268_s22, 2  ;;  %s873_s11 = sshll.u32 %s1270_s10, 4 }
   0xf   : > { %s221_s26 = scalar_lea.vmem %s1261_s0, %s838_s23  ;;  %s1240_s14 = scalar_lea.vmem %s1266_s5, %s873_s11 }
  0x10   : > { %v958_v1 = vld [vmem:[%s221_s26] sm:$0xff]   ;;  %v959_v2 = vld [vmem:[%s221_s26 + $0x8] sm:$0xff]   ;;  %v960_v3 = vld [vmem:[%s221_s26 + $0x10] sm:$0xff]  }
  0x11   : > { %897 = vmatprep.mubr.msk.bf16.mxu0 %vm302_vm0, %v958_v1  ;;  %v961_v4 = vld [vmem:[%s221_s26 + $0x18] sm:$0xff]   ;;  %v962_v5 = vld [vmem:[%s221_s26 + $0x20] sm:$0xff]   ;;  %v963_v6 = vld [vmem:[%s221_s26 + $0x28] sm:$0xff]  }
  0x12   : > { %898 = vmatmul.mubr.msk.bf16.vlgmr.msra.gmra.mrb[0].mxu0 %vm302_vm0, %v959_v2  ;;  %v964_v7 = vld [vmem:[%s221_s26 + $0x30] sm:$0xff]   ;;  %v965_v8 = vld [vmem:[%s221_s26 + $0x38] sm:$0xff]  }
  0x13   : > { %901 = vmatprep.mubr.msk.bf16.mxu0 %vm302_vm0, %v960_v3 }
  0x1a   : > { %902 = vmatmul.mubr.msk.bf16.gmra.mrb[4].mxu0 %vm302_vm0, %v961_v4 }
  0x1b   : > { %905 = vmatprep.mubr.msk.bf16.mxu0 %vm302_vm0, %v962_v5 }
  0x22   : > { %906 = vmatmul.mubr.msk.bf16.gmra.mrb[8].mxu0 %vm302_vm0, %v963_v6 }
  0x23   : > { %909 = vmatprep.mubr.msk.bf16.mxu0 %vm302_vm0, %v964_v7 }
  0x2a   : > { %910 = vmatmul.mubr.msk.bf16.gmra.mrb[12].mxu0 %vm302_vm0, %v965_v8 }
  0xe5   : > { %v899_v14 = vpop.f32.mrb[0].mxu0 }
  0xe6   : > { %v1079_v15 = vadd.f32 %v899_v14, %v1076_v13  ;;  %v361_v16 = vpop.f32.mrb[1].mxu0 }
  0xe7   : > { %v1082_v17 = vadd.f32 %v1076_v13, %v361_v16  ;;  %v900_v18 = vpop.f32.mrb[2].mxu0 }
  0xe8   : > { %v426_v19 = vmul.f32 %v1079_v15, %v1079_v15  ;;  %v1087_v20 = vadd.f32 %v900_v18, %v1076_v13  ;;  %v364_v21 = vpop.f32.mrb[3].mxu0 }
  0xe9   : > { %v424_v22 = vmul.f32 %v1082_v17, %v1082_v17  ;;  %v1092_v23 = vadd.f32 %v1076_v13, %v364_v21 }
  0xea   : > { %v442_v24 = vmul.f32 %v426_v19, %v1079_v15  ;;  %v427_v25 = vmul.f32 %v1087_v20, %v1087_v20 }
  0xeb   : > { %v440_v26 = vmul.f32 %v424_v22, %v1082_v17  ;;  %v425_v27 = vmul.f32 %v1092_v23, %v1092_v23 }
  0xec   : > { %v458_v28 = vmul.f32 0.044715, %v442_v24  ;;  %v443_v29 = vmul.f32 %v427_v25, %v1087_v20 }
  0xed   : > { %v456_v30 = vmul.f32 0.044715, %v440_v26  ;;  %v441_v31 = vmul.f32 %v425_v27, %v1092_v23  ;;  %v903_v32 = vpop.f32.mrb[4].mxu0 }
  0xee   : > { %v474_v33 = vadd.f32 %v458_v28, %v1079_v15  ;;  %v459_v34 = vmul.f32 0.044715, %v443_v29  ;;  %v1104_v35 = vadd.f32 %v903_v32, %v1076_v13  ;;  %v377_v36 = vpop.f32.mrb[5].mxu0 }
  0xef   : > { %v472_v37 = vadd.f32 %v456_v30, %v1082_v17  ;;  %v457_v38 = vmul.f32 0.044715, %v441_v31  ;;  %v1108_v39 = vadd.f32 %v1076_v13, %v377_v36  ;;  %v904_v40 = vpop.f32.mrb[6].mxu0 }
  0xf0   : > { %v490_v41 = vmul.f32 0.7978846, %v474_v33  ;;  %v475_v42 = vadd.f32 %v459_v34, %v1087_v20  ;;  %v430_v43 = vmul.f32 %v1104_v35, %v1104_v35  ;;  %v1114_v44 = vadd.f32 %v904_v40, %v1076_v13  ;;  %v380_v45 = vpop.f32.mrb[7].mxu0 }
  0xf1   : > { %v488_v46 = vmul.f32 0.7978846, %v472_v37  ;;  %v473_v47 = vadd.f32 %v457_v38, %v1092_v23  ;;  %v428_v48 = vmul.f32 %v1108_v39, %v1108_v39  ;;  %v1120_v49 = vadd.f32 %v1076_v13, %v380_v45 }
  0xf2   : > { %967 = vtanh.f32 %v490_v41  ;;  %v491_v50 = vmul.f32 0.7978846, %v475_v42  ;;  %v446_v51 = vmul.f32 %v430_v43, %v1104_v35  ;;  %v431_v52 = vmul.f32 %v1114_v44, %v1114_v44 }
  0xf3   : > { %v489_v53 = vmul.f32 0.7978846, %v473_v47  ;;  %v444_v54 = vmul.f32 %v428_v48, %v1108_v39  ;;  %v429_v55 = vmul.f32 %v1120_v49, %v1120_v49  ;;  %969 = vtanh.f32 %v488_v46 }
  0xf4   : > { %971 = vtanh.f32 %v491_v50  ;;  %v462_v56 = vmul.f32 0.044715, %v446_v51  ;;  %v447_v57 = vmul.f32 %v431_v52, %v1114_v44 }
  0xf5   : > { %v460_v58 = vmul.f32 0.044715, %v444_v54  ;;  %v445_v59 = vmul.f32 %v429_v55, %v1120_v49  ;;  %v907_v60 = vpop.f32.mrb[8].mxu0  ;;  %973 = vtanh.f32 %v489_v53 }
  0xf6   : > { %v478_v61 = vadd.f32 %v462_v56, %v1104_v35  ;;  %v463_v62 = vmul.f32 0.044715, %v447_v57  ;;  %v1132_v63 = vadd.f32 %v907_v60, %v1076_v13  ;;  %v393_v0 = vpop.f32.mrb[9].mxu0 }
  0xf7   : > { %v476_v1 = vadd.f32 %v460_v58, %v1108_v39  ;;  %v461_v2 = vmul.f32 0.044715, %v445_v59  ;;  %v1136_v3 = vadd.f32 %v1076_v13, %v393_v0  ;;  %v908_v4 = vpop.f32.mrb[10].mxu0 }
  0xf8   : > { %v494_v5 = vmul.f32 0.7978846, %v478_v61  ;;  %v479_v6 = vadd.f32 %v463_v62, %v1114_v44  ;;  %v434_v7 = vmul.f32 %v1132_v63, %v1132_v63  ;;  %v1142_v8 = vadd.f32 %v908_v4, %v1076_v13  ;;  %v396_v10 = vpop.f32.mrb[11].mxu0 }
  0xf9   : > { %v492_v11 = vmul.f32 0.7978846, %v476_v1  ;;  %v477_v12 = vadd.f32 %v461_v2, %v1120_v49  ;;  %v432_v14 = vmul.f32 %v1136_v3, %v1136_v3  ;;  %v1148_v16 = vadd.f32 %v1076_v13, %v396_v10 }
  0xfa   : > { %975 = vtanh.f32 %v494_v5  ;;  %v495_v18 = vmul.f32 0.7978846, %v479_v6  ;;  %v450_v19 = vmul.f32 %v434_v7, %v1132_v63  ;;  %v435_v21 = vmul.f32 %v1142_v8, %v1142_v8 }
  0xfb   : > { %977 = vtanh.f32 %v492_v11  ;;  %v493_v22 = vmul.f32 0.7978846, %v477_v12  ;;  %v448_v24 = vmul.f32 %v432_v14, %v1136_v3  ;;  %v433_v25 = vmul.f32 %v1148_v16, %v1148_v16 }
  0xfc   : > { %v968_v26 = vpop.eup %967  ;;  %979 = vtanh.f32 %v495_v18  ;;  %v466_v27 = vmul.f32 0.044715, %v450_v19  ;;  %v451_v28 = vmul.f32 %v435_v21, %v1142_v8 }
  0xfd   : > { %v970_v29 = vpop.eup %969  ;;  %981 = vtanh.f32 %v493_v22  ;;  %v464_v30 = vmul.f32 0.044715, %v448_v24  ;;  %v449_v31 = vmul.f32 %v433_v25, %v1148_v16  ;;  %v911_v32 = vpop.f32.mrb[12].mxu0  ;;  %v1158_v33 = vadd.f32 1.0, %v968_v26 }
  0xfe   : > { %v972_v34 = vpop.eup %971  ;;  %v482_v36 = vadd.f32 %v466_v27, %v1132_v63  ;;  %v467_v37 = vmul.f32 0.044715, %v451_v28  ;;  %v1162_v38 = vadd.f32 %v911_v32, %v1076_v13  ;;  %v409_v40 = vpop.f32.mrb[13].mxu0  ;;  %v520_v41 = vadd.f32 1.0, %v970_v29 }
  0xff   : > { %v480_v42 = vadd.f32 %v464_v30, %v1136_v3  ;;  %v465_v43 = vmul.f32 0.044715, %v449_v31  ;;  %v1166_v45 = vadd.f32 %v1076_v13, %v409_v40  ;;  %v912_v46 = vpop.f32.mrb[14].mxu0  ;;  %v1168_v47 = vadd.f32 1.0, %v972_v34  ;;  %v974_v54 = vpop.eup %973 }
 0x100   : > { %v498_v48 = vmul.f32 0.7978846, %v482_v36  ;;  %v483_v50 = vadd.f32 %v467_v37, %v1142_v8  ;;  %v438_v51 = vmul.f32 %v1162_v38, %v1162_v38  ;;  %v1174_v52 = vadd.f32 %v912_v46, %v1076_v13  ;;  %v412_v53 = vpop.f32.mrb[15].mxu0 }
 0x101   : > { %v496_v55 = vmul.f32 0.7978846, %v480_v42  ;;  %v481_v56 = vadd.f32 %v465_v43, %v1148_v16  ;;  %v436_v57 = vmul.f32 %v1166_v45, %v1166_v45  ;;  %v1180_v58 = vadd.f32 %v1076_v13, %v412_v53 }
 0x102   : > { %983 = vtanh.f32 %v498_v48  ;;  %v499_v59 = vmul.f32 0.7978846, %v483_v50  ;;  %v454_v60 = vmul.f32 %v438_v51, %v1162_v38  ;;  %v439_v61 = vmul.f32 %v1174_v52, %v1174_v52 }
 0x103   : > { %985 = vtanh.f32 %v496_v55  ;;  %v497_v62 = vmul.f32 0.7978846, %v481_v56  ;;  %v452_v0 = vmul.f32 %v436_v57, %v1166_v45  ;;  %v437_v1 = vmul.f32 %v1180_v58, %v1180_v58 }
 0x104   : > { %v976_v2 = vpop.eup %975  ;;  %987 = vtanh.f32 %v499_v59  ;;  %v470_v4 = vmul.f32 0.044715, %v454_v60  ;;  %v455_v13 = vmul.f32 %v439_v61, %v1174_v52  ;;  %v521_v5 = vadd.f32 1.0, %v974_v54 }
 0x105   : > { %v978_v6 = vpop.eup %977  ;;  %v526_v7 = vadd.f32 1.0, %v976_v2  ;;  %989 = vtanh.f32 %v497_v62  ;;  %v468_v10 = vmul.f32 0.044715, %v452_v0  ;;  %v453_v11 = vmul.f32 %v437_v1, %v1180_v58 }
 0x106   : > { %v980_v12 = vpop.eup %979  ;;  %v524_v14 = vadd.f32 1.0, %v978_v6  ;;  %v486_v18 = vadd.f32 %v470_v4, %v1162_v38  ;;  %v471_v19 = vmul.f32 0.044715, %v455_v13  ;;  %v536_v21 = vmul.f32 0.5, %v520_v41 }
 0x107   : > { %v982_v22 = vpop.eup %981  ;;  %v542_v24 = vmul.f32 0.5, %v526_v7  ;;  %v527_v25 = vadd.f32 1.0, %v980_v12  ;;  %v484_v26 = vadd.f32 %v468_v10, %v1166_v45  ;;  %v469_v27 = vmul.f32 0.044715, %v453_v11 }
 0x108   : > { %v540_v28 = vmul.f32 0.5, %v524_v14  ;;  %v525_v29 = vadd.f32 1.0, %v982_v22  ;;  %v502_v30 = vmul.f32 0.7978846, %v486_v18  ;;  %v487_v31 = vadd.f32 %v471_v19, %v1174_v52 }
 0x109   : > { %v1194_v32 = vmul.f32 %v542_v24, %v1104_v35  ;;  %v543_v34 = vmul.f32 0.5, %v527_v25  ;;  %v500_v36 = vmul.f32 0.7978846, %v484_v26  ;;  %v485_v37 = vadd.f32 %v469_v27, %v1180_v58 }
 0x10a   : > { %v556_v40 = vmul.f32 %v540_v28, %v1108_v39  ;;  %v541_v41 = vmul.f32 0.5, %v525_v29  ;;  %991 = vtanh.f32 %v502_v30  ;;  %v503_v42 = vmul.f32 0.7978846, %v487_v31 }
 0x10b   : > { %v559_v43 = vmul.f32 %v543_v34, %v1114_v44  ;;  %993 = vtanh.f32 %v500_v36  ;;  %v501_v46 = vmul.f32 0.7978846, %v485_v37  ;;  %v537_v48 = vmul.f32 0.5, %v521_v5 }
 0x10c   : > { %v984_v50 = vpop.eup %983  ;;  %v557_v51 = vmul.f32 %v541_v41, %v1120_v49  ;;  %995 = vtanh.f32 %v503_v42  ;;  %v552_v35 = vmul.f32 %v536_v21, %v1082_v17  ;;  %v538_v53 = vmul.f32 0.5, %v1158_v33 }
 0x10d   : > { %v986_v54 = vpop.eup %985  ;;  %v530_v55 = vadd.f32 1.0, %v984_v50  ;;  %997 = vtanh.f32 %v501_v46  ;;  %v553_v39 = vmul.f32 %v537_v48, %v1092_v23  ;;  %v539_v56 = vmul.f32 0.5, %v1168_v47 }
 0x10e   : > { %v988_v57 = vpop.eup %987  ;;  %v528_v44 = vadd.f32 1.0, %v986_v54  ;;  %v554_v59 = vmul.f32 %v538_v53, %v1079_v15  ;;  %v570_v60 = vpack.c.bf16 %v557_v51, %v556_v40  ;;  %v571_v61 = vpack.c.bf16 %v559_v43, %v1194_v32 }
 0x10f   : > { %v990_v49 = vpop.eup %989  ;;  %v546_v62 = vmul.f32 0.5, %v530_v55  ;;  %v531_v0 = vadd.f32 1.0, %v988_v57  ;;  %v568_v17 = vpack.c.bf16 %v553_v39, %v552_v35  ;;  %v555_v33 = vmul.f32 %v539_v56, %v1087_v20  ;;  %v966_v20 = vld [vmem:[%s1264_s3] sm:$0xff]  }
 0x110   : > { %v544_v1 = vmul.f32 0.5, %v528_v44  ;;  %v529_v2 = vadd.f32 1.0, %v990_v49 }
 0x111   : > { %v547_v4 = vmul.f32 0.5, %v531_v0  ;;  %914 = vmatpush3.bf16.msra.mxu1 %v568_v17  ;;  %v569_v23 = vpack.c.bf16 %v555_v33, %v554_v59  ;;  %v562_v47 = vmul.f32 %v546_v62, %v1132_v63 }
 0x112   : > { %v545_v13 = vmul.f32 0.5, %v529_v2  ;;  %915 = vmatprep.subr.bf16.mxu1 %v1007_v9  ;;  %v560_v6 = vmul.f32 %v544_v1, %v1136_v3 }
 0x113   : > { %v563_v15 = vmul.f32 %v547_v4, %v1142_v8 }
 0x114   : > { %v992_v5 = vpop.eup %991  ;;  %v561_v7 = vmul.f32 %v545_v13, %v1148_v16 }
 0x115   : > { %v994_v10 = vpop.eup %993  ;;  %v534_v11 = vadd.f32 1.0, %v992_v5  ;;  %916 = vmatpush3.bf16.msra.mxu1 %v569_v23  ;;  %v573_v12 = vpack.c.bf16 %v563_v15, %v562_v47 }
 0x116   : > { %v996_v14 = vpop.eup %995  ;;  %v532_v18 = vadd.f32 1.0, %v994_v10  ;;  %921 = vmatprep.subr.bf16.mxu1 %v1007_v9  ;;  %v572_v63 = vpack.c.bf16 %v561_v7, %v560_v6 }
 0x117   : > { %v998_v8 = vpop.eup %997  ;;  %v550_v19 = vmul.f32 0.5, %v534_v11  ;;  %v535_v21 = vadd.f32 1.0, %v996_v14 }
 0x118   : > { %v548_v3 = vmul.f32 0.5, %v532_v18  ;;  %v533_v22 = vadd.f32 1.0, %v998_v8  ;;  %918 = vmatmul.mubr.msk.bf16.vlgmr.msra.gmra.mrb[0].mxu1 %vm595_vm2, %v966_v20 }
 0x119   : > { %v551_v16 = vmul.f32 0.5, %v535_v21  ;;  %922 = vmatpush3.bf16.msra.mxu1 %v570_v60  ;;  %925 = vmatprep.mubr.msk.bf16.mxu1 %vm1008_vm1, %v1007_v9  ;;  %v566_v25 = vmul.f32 %v550_v19, %v1162_v38  ;;  %v583_v38 = vpop.permute.xlu0 %582 }
 0x11a   : > { %v549_v24 = vmul.f32 0.5, %v533_v22  ;;  %923 = vmatprep.subr.bf16.mxu1 %v1007_v9  ;;  %v564_v27 = vmul.f32 %v548_v3, %v1166_v45 }
 0x11b   : > { %v567_v26 = vmul.f32 %v551_v16, %v1174_v52 }
 0x11c   : > { %v565_v28 = vmul.f32 %v549_v24, %v1180_v58 }
 0x11d   : > { %924 = vmatpush3.bf16.msra.mxu1 %v571_v61  ;;  %v575_v29 = vpack.c.bf16 %v567_v26, %v566_v25 }
 0x11e   : > { %929 = vmatprep.subr.bf16.mxu1 %v1007_v9  ;;  %v574_v30 = vpack.c.bf16 %v565_v28, %v564_v27 }
 0x120   : > { %926 = vmatmul.mubr.msk.bf16.vlgmr.msra.gmra.mrb[4].mxu1 %vm595_vm2, %v966_v20 }
 0x121   : > { %930 = vmatpush3.bf16.msra.mxu1 %v572_v63  ;;  %933 = vmatprep.mubr.msk.bf16.mxu1 %vm1008_vm1, %v1007_v9 }
 0x122   : > { %931 = vmatprep.subr.bf16.mxu1 %v1007_v9 }
 0x125   : > { %932 = vmatpush3.bf16.msra.mxu1 %v573_v12 }
 0x126   : > { %937 = vmatprep.subr.bf16.mxu1 %v1007_v9 }
 0x128   : > { %934 = vmatmul.mubr.msk.bf16.vlgmr.msra.gmra.mrb[8].mxu1 %vm595_vm2, %v966_v20 }
 0x129   : > { %938 = vmatpush3.bf16.msra.mxu1 %v574_v30  ;;  %941 = vmatprep.mubr.msk.bf16.mxu1 %vm1008_vm1, %v1007_v9 }
 0x12a   : > { %939 = vmatprep.subr.bf16.mxu1 %v1007_v9  ;;  %v588_v9 = vpop.permute.xlu0 %587 }
 0x12d   : > { %940 = vmatpush3.bf16.msra.mxu1 %v575_v29 }
 0x130   : > { %942 = vmatmul.mubr.msk.bf16.vlgmr.msra.gmra.mrb[12].mxu1 %vm595_vm2, %v966_v20 }
 0x1eb   : > { %v633_v45 = vpop.f32.mrb[0].mxu1 }
 0x1ec   : > { %v634_v52 = vadd.f32 %v633_v45, %v583_v38  ;;  %v919_v58 = vpop.f32.mrb[1].mxu1 }
 0x1ed   : > { %v636_v31 = vpop.f32.mrb[2].mxu1 }
 0x1ee   : > { %640 = vst.msk [vmem:[%s1240_s14] sm:$0xff] %vm595_vm2, %v634_v52  ;;  %v637_v32 = vadd.f32 %v636_v31, %v588_v9  ;;  %v920_v34 = vpop.f32.mrb[3].mxu1 }
 0x1f0   : > { %641 = vst.msk [vmem:[%s1240_s14 + $0x8] sm:$0xff] %vm595_vm2, %v637_v32 }
 0x1f3   : > { %v676_v36 = vpop.f32.mrb[4].mxu1 }
 0x1f4   : > { %v677_v37 = vadd.f32 %v676_v36, %v583_v38  ;;  %v927_v40 = vpop.f32.mrb[5].mxu1 }
 0x1f5   : > { %v679_v41 = vpop.f32.mrb[6].mxu1 }
 0x1f6   : > { %863 = vst.msk [vmem:[%s1240_s14 + $0x10] sm:$0xff] %vm595_vm2, %v677_v37  ;;  %v680_v42 = vadd.f32 %v679_v41, %v588_v9  ;;  %v928_v43 = vpop.f32.mrb[7].mxu1 }
 0x1f8   : > { %864 = vst.msk [vmem:[%s1240_s14 + $0x18] sm:$0xff] %vm595_vm2, %v680_v42 }
 0x1fb   : > { %v720_v46 = vpop.f32.mrb[8].mxu1 }
 0x1fc   : > { %v721_v48 = vadd.f32 %v720_v46, %v583_v38  ;;  %v935_v50 = vpop.f32.mrb[9].mxu1 }
 0x1fd   : > { %v723_v51 = vpop.f32.mrb[10].mxu1 }
 0x1fe   : > { %866 = vst.msk [vmem:[%s1240_s14 + $0x20] sm:$0xff] %vm595_vm2, %v721_v48  ;;  %v724_v35 = vadd.f32 %v723_v51, %v588_v9  ;;  %v936_v53 = vpop.f32.mrb[11].mxu1 }
 0x200   : > { %867 = vst.msk [vmem:[%s1240_s14 + $0x28] sm:$0xff] %vm595_vm2, %v724_v35 }
 0x203   : > { %v764_v54 = vpop.f32.mrb[12].mxu1 }
 0x204   : > { %v765_v55 = vadd.f32 %v764_v54, %v583_v38  ;;  %v943_v39 = vpop.f32.mrb[13].mxu1 }
 0x205   : > { %v767_v56 = vpop.f32.mrb[14].mxu1 }
 0x206   : > { %869 = vst.msk [vmem:[%s1240_s14 + $0x30] sm:$0xff] %vm595_vm2, %v765_v55  ;;  %v768_v57 = vadd.f32 %v767_v56, %v588_v9  ;;  %v944_v44 = vpop.f32.mrb[15].mxu1 }
 0x208   : > { %870 = vst.msk [vmem:[%s1240_s14 + $0x38] sm:$0xff] %vm595_vm2, %v768_v57 }
 0x209 PF: > { %s15_s18 = sadd.s32 1, %s1005_s18  }
 0x20a   : > { %p12_p5 = scmp.ge.s32.totalorder %s15_s18, 4  }
 0x20c   :  { %14 = sbr.rel (!%p12_p5) target bundleno = 1 (0x1), region = 73 }

</bundles_post_ra>
